<compile_context>
chip_gen: v6e
topology: v6e:2x2x1
jax: 0.10.0
libtpu: 0.0.40
codegen_flags: <defaults>
</compile_context>

<pallas_src>
import math

import jax
import jax.numpy as jnp
from jax.experimental import pallas as pl
from jax.experimental.pallas import tpu as pltpu


def _bert_pooler_kernel(x_ref, w_ref, b_ref, o_ref):
    # Fused Linear + Tanh on a (TB, D) activation slab.
    y = jnp.dot(x_ref[...], w_ref[...], preferred_element_type=jnp.float32)
    y = y + b_ref[...]                        # (1, D) bias broadcasts over rows
    o_ref[...] = jnp.tanh(y).astype(o_ref.dtype)


def bert_pooler(first_token_tensor, w, b, *, block_b=None):
    """first_token_tensor: (B, D); w: (D, D) == torch weight.T; b: (D,)."""
    B, D = first_token_tensor.shape
    assert w.shape == (D, D)
    assert b.shape == (D,)

    if block_b is None:
        # Fold the whole (small) batch into one block; for big batches use
        # 256-row blocks (multiple of 8 sublanes) so the grid has >= 2
        # parallel steps and both v7x TensorCores can be used.
        block_b = B if B <= 512 else 256
    if block_b != B:
        assert block_b % 8 == 0, "partial batch blocks must be sublane aligned"

    b2d = b.reshape(1, D)  # keep refs >= 2-D on TPU

    grid = (pl.cdiv(B, block_b),)

    return pl.pallas_call(
        _bert_pooler_kernel,
        out_shape=jax.ShapeDtypeStruct((B, D), first_token_tensor.dtype),
        grid=grid,
        in_specs=[
            pl.BlockSpec((block_b, D), lambda i: (i, 0)),   # activations (batch-tiled)
            pl.BlockSpec((D, D), lambda i: (0, 0)),         # weight (constant block)
            pl.BlockSpec((1, D), lambda i: (0, 0)),         # bias   (constant block)
        ],
        out_specs=pl.BlockSpec((block_b, D), lambda i: (i, 0)),
        compiler_params=pltpu.CompilerParams(
            dimension_semantics=("parallel",)),
    )(first_token_tensor, w, b2d)


def _reference(x, w, b):
    """Plain-JAX replica of the PyTorch BertPooler forward."""
    return jnp.tanh(x @ w + b)


if __name__ == "__main__":
    B, D = 2, 32  # batch, hidden_dim

    key0 = jax.random.PRNGKey(0)
    k_w, k_b, k_x = jax.random.split(key0, 3)

    # Deterministic parameter init (synthetic; no checkpoint loading).
    # Stored as (in, out) so the projection is x @ W + b (== Linear with W = weight.T).
    w = jax.random.normal(k_w, (D, D), jnp.float32) * (1.0 / math.sqrt(D))
    b = jax.random.normal(k_b, (D,), jnp.float32) * 0.01
    first_token_tensor = jax.random.normal(k_x, (B, D), jnp.float32)

    out = bert_pooler(first_token_tensor, w, b)
    out = jax.block_until_ready(out)

    ref = _reference(first_token_tensor, w, b)
    assert out.shape == (B, D)
    assert jnp.allclose(out, ref, atol=1e-5, rtol=1e-5), "mismatch vs reference"

    print("KERNEL_OK")
</pallas_src>

<mosaic_0001>
module attributes {stable_mosaic.version = 11 : i64} {
  func.func @_bert_pooler_kernel(%arg0: i32, %arg1: memref<2x32xf32, #tpu.memory_space<vmem>>, %arg2: memref<32x32xf32, #tpu.memory_space<vmem>>, %arg3: memref<1x32xf32, #tpu.memory_space<vmem>>, %arg4: memref<2x32xf32, #tpu.memory_space<vmem>>) attributes {dimension_semantics = [#tpu.dimension_semantics<parallel>], iteration_bounds = array<i64: 1>, scalar_prefetch = 0 : i64, scratch_operands = 0 : i64, tpu.core_type = #tpu.core_type<tc>, window_params = [{transform_indices = @transform_0, window_bounds = array<i64: 2, 32>}, {pipeline_mode = #tpu.pipeline_mode<synchronous>, transform_indices = @transform_1, window_bounds = array<i64: 32, 32>}, {pipeline_mode = #tpu.pipeline_mode<synchronous>, transform_indices = @transform_2, window_bounds = array<i64: 1, 32>}, {transform_indices = @transform_3, window_bounds = array<i64: 2, 32>}]} {
    %c0 = arith.constant 0 : index
    %c0_0 = arith.constant 0 : index
    %0 = vector.load %arg1[%c0, %c0_0] : memref<2x32xf32, #tpu.memory_space<vmem>>, vector<2x32xf32>
    %c0_1 = arith.constant 0 : index
    %c0_2 = arith.constant 0 : index
    %1 = vector.load %arg2[%c0_1, %c0_2] : memref<32x32xf32, #tpu.memory_space<vmem>>, vector<32x32xf32>
    %cst = arith.constant dense<0.000000e+00> : vector<2x32xf32>
    %2 = tpu.matmul %0, %1, %cst {dimension_numbers = #tpu.dot_dimension_numbers<[1], [0], [0], [1], [0, 0, 1, 1], [], []>} : vector<2x32xf32>, vector<32x32xf32>, vector<2x32xf32> -> vector<2x32xf32>
    %c0_3 = arith.constant 0 : index
    %c0_4 = arith.constant 0 : index
    %3 = vector.load %arg3[%c0_3, %c0_4] : memref<1x32xf32, #tpu.memory_space<vmem>>, vector<1x32xf32>
    %4 = vector.broadcast %3 : vector<1x32xf32> to vector<2x32xf32>
    %5 = arith.addf %2, %4 : vector<2x32xf32>
    %6 = math.tanh %5 : vector<2x32xf32>
    %c0_5 = arith.constant 0 : index
    %c0_6 = arith.constant 0 : index
    %7 = vector.load %arg4[%c0_5, %c0_6] : memref<2x32xf32, #tpu.memory_space<vmem>>, vector<2x32xf32>
    tpu.vector_store %arg4[%c0_5, %c0_6], %6 {strides = array<i32>} : memref<2x32xf32, #tpu.memory_space<vmem>>, vector<2x32xf32>,
    return
  }
  func.func @transform_0(%arg0: i32) -> (i32, i32) {
    %c0_i32 = arith.constant 0 : i32
    %c0_i32_0 = arith.constant 0 : i32
    return %arg0, %c0_i32 : i32, i32
  }
  func.func @transform_1(%arg0: i32) -> (i32, i32) {
    %c0_i32 = arith.constant 0 : i32
    %c0_i32_0 = arith.constant 0 : i32
    %c0_i32_1 = arith.constant 0 : i32
    return %c0_i32, %c0_i32_0 : i32, i32
  }
  func.func @transform_2(%arg0: i32) -> (i32, i32) {
    %c0_i32 = arith.constant 0 : i32
    %c0_i32_0 = arith.constant 0 : i32
    %c0_i32_1 = arith.constant 0 : i32
    return %c0_i32, %c0_i32_0 : i32, i32
  }
  func.func @transform_3(%arg0: i32) -> (i32, i32) {
    %c0_i32 = arith.constant 0 : i32
    %c0_i32_0 = arith.constant 0 : i32
    return %arg0, %c0_i32 : i32, i32
  }
}

</mosaic_0001>

<bundles_post_ra>
// kernel: tpu_custom_call.1
= control target key start
LH: loop header
LB: loop body
LE: loop exit
PB: predicated region body
PF: predicated region fallthrough
CT: control target
= control target key end

     0   :  { %8 = vsyncpa [#allocation3], 0  ;;  %s278_s0 = inlined_call_operand.hbm [shape: f32[2,32], index: 0, kind: input, shape index: {}]   ;;  %s279_s1 = inlined_call_operand.hbm [shape: f32[32,32], index: 1, kind: input, shape index: {}]   ;;  %s280_s2 = inlined_call_operand.vmem [shape: f32[1,32], index: 2, kind: input, shape index: {}]   ;;  %s281_s3 = inlined_call_operand.hbm [shape: f32[2,32], index: 3, kind: output, shape index: {}]  }
   0x1   :  { %9 = vsyncpa [#allocation6], 0 }
   0x2   :  { %10 = vsyncpa [#allocation4], 0  ;;  %s239_s12 = smov [#allocation2]   ;;  %s240_s14 = smov [#allocation5]  }
   0x3   :  { %s17_s13 = sshll.u32 %s239_s12, 4  ;;  %s26_s15 = sshll.u32 %s240_s14, 4  ;;  %s18_s13 = int_to_ptr.vmem [resolvable:$true] %s17_s13  ;;  %s27_s15 = int_to_ptr.vmem [resolvable:$true] %s26_s15 }
   0x4   :  { %s181_s16 = scalar_lea.vmem %s18_s13, 32  ;;  %p186_p1 = scmp.lt.s32.totalorder %s18_s13, %s18_s13 }
   0x5   :  { %p182_p0 = scmp.ne.s32.totalorder %s18_s13, %s181_s16  ;;  %p187_p2 = scmp.lt.s32.totalorder %s181_s16, %s181_s16 }
   0x7   :  { %p188_p3 = por %p187_p2, %p186_p1 }
   0x9   :  { %p189_p4 = pnand %p188_p3, %p182_p0 }
   0xb   :  { %192 = shalt.err (!%p189_p4)
}
   0xc   :  { %20 = dma.hbm_to_vmem [thread:$0]  %s278_s0, 32, %s18_s13, [#allocation3]  }
   0xd   :  { %s201_s19 = scalar_lea.vmem %s27_s15, 512  ;;  %p206_p6 = scmp.lt.s32.totalorder %s27_s15, %s27_s15 }
   0xe   :  { %p202_p5 = scmp.ne.s32.totalorder %s27_s15, %s201_s19  ;;  %p207_p7 = scmp.lt.s32.totalorder %s201_s19, %s201_s19 }
  0x10   :  { %p208_p8 = por %p207_p7, %p206_p6 }
  0x12   :  { %p209_p9 = pnand %p208_p8, %p202_p5 }
  0x14   :  { %212 = shalt.err (!%p209_p9)
}
  0x15   :  { %s241_s20 = smov 128   ;;  %s242_s21 = smov 8  }
  0x16   :  { %32 = dma.hbm_to_vmem [thread:$0]  %s279_s1, 512, %s27_s15, [#allocation6], %s241_s20, %s241_s20, %s242_s21  }
  0x17   :  { %233 = dma.done.wait [#allocation3], 32  }
  0x18   :  { %234 = vsyncadd [#allocation3], 4294967264 }
  0x19   :  { %235 = dma.done.wait [#allocation6], 512  }
  0x1a   :  { %236 = vsyncadd [#allocation6], 4294966784  ;;  %v243_v0 = vmov 0.0   ;;  %vm244_vm0 = vmmov 0   ;;  %v45_v1 = vld [vmem:[#allocation5 + $0x18] sm:$0xff]  ;;  %v44_v2 = vld [vmem:[#allocation5 + $0x10] sm:$0xff] }
  0x1b   :  { %153 = vmatprep.subr.mxu0 %v243_v0  ;;  %161 = vmatprep.mubr.msk.f32.mxu0 %vm244_vm0, %v243_v0  ;;  %v43_v3 = vld [vmem:[#allocation5 + $0x8] sm:$0xff]  ;;  %v42_v4 = vld [vmem:[#allocation5] sm:$0xff]  ;;  %v41_v5 = vld [vmem:[#allocation2] sm:$0x3]  ;;  %vm53_vm1 = vcmask 261120   ;;  %s245_s24 = smov [#allocation7]  }
  0x1c   :  { %154 = vmatpush3.msra.mxu0 %v45_v1  ;;  %v146_v6 = vld [vmem:[%s280_s2] ss:$0 sm:$0xff]  ;;  %s136_s25 = sshll.u32 %s245_s24, 4  ;;  %vm128_vm2 = vcmask 254976   ;;  %s137_s25 = int_to_ptr.vmem [resolvable:$true] %s136_s25 }
  0x1d   :  { %155 = vmatprep.subr.mxu0 %v243_v0  ;;  %s213_s26 = scalar_lea.vmem %s137_s25, 32  ;;  %p218_p11 = scmp.lt.s32.totalorder %s137_s25, %s137_s25 }
  0x1e   :  { %156 = vmatpush3.msra.mxu0 %v44_v2  ;;  %p214_p10 = scmp.ne.s32.totalorder %s137_s25, %s213_s26  ;;  %p219_p12 = scmp.lt.s32.totalorder %s213_s26, %s213_s26 }
  0x1f   :  { %157 = vmatprep.subr.mxu0 %v243_v0 }
  0x20   :  { %158 = vmatpush3.msra.mxu0 %v43_v3  ;;  %p220_p13 = por %p219_p12, %p218_p11 }
  0x21   :  { %159 = vmatprep.subr.mxu0 %v243_v0 }
  0x22   :  { %160 = vmatpush3.msra.mxu0 %v42_v4  ;;  %p221_p0 = pnand %p220_p13, %p214_p10 }
  0x23   :  { %162 = vmatmul.mubr.msk.f32.vlgmr.msra.gmra.mxu0 %vm53_vm1, %v41_v5 }
  0xe3   :  { %v123_v7 = vpop.f32.mrf.mxu0 }
  0xe4   :  { %v124_v8 = vadd.f32 %v146_v6, %v123_v7 }
  0xe5   :  { %v163_v9 = vpop.f32.mrf.mxu0 }
  0xe6   :  { %171 = vtanh.f32 %v124_v8 }
  0xf3   :  { %v172_v10 = vpop.eup %171 }
  0xf4   :  { %129 = vst.msk [vmem:[#allocation7] sm:$0x3] %vm128_vm2, %v172_v10 }
  0xf5   :  { %224 = shalt.err (!%p221_p0)
}
  0xf6   :  { %139 = dma.vmem_to_hbm [thread:$0]  %s137_s25, 32, %s281_s3, [#allocation4]  }
  0xf7   :  { %237 = dma.done.wait [#allocation4], 32  }
  0xf8   :  { %238 = vsyncadd [#allocation4], 4294967264 }
  0xf9   :  { %143 = vsyncpa [#allocation3], 1 }
  0xfa   :  { %144 = vsyncpa [#allocation6], 1 }
  0xfb   :  { %145 = vsyncpa [#allocation4], 1 }

</bundles_post_ra>
